<compile_context>
chip_gen: v7x
topology: tpu7x:2x2x1
jax: 0.10.0
libtpu: 0.0.40
codegen_flags: <defaults>
</compile_context>

<pallas_src>
import jax
import jax.numpy as jnp
from jax.experimental import pallas as pl
from jax.experimental.pallas import tpu as pltpu


# Default packed rows per grid step (== 8192 unpacked rows when P = 4).
# Big enough to amortize the ~0.35 us per-grid-step overhead on v6e/v7x while
# keeping the double-buffered footprint a few MiB.  Sweep 1024-4096 per chip.
_TILE_ROWS_DEFAULT = 2048


def _round_up(n, m):
    return (n + m - 1) // m * m


def _choose_tile_rows(rows, requested):
    """Sublane-aligned tile; >= 2 grid steps when the batch allows (megacore)."""
    if rows <= 8:
        return rows  # single tiny block; sublane dim equals the full array dim
    half = _round_up((rows + 1) // 2, 8)
    return max(8, min(requested, half))


def _mlp_kernel(x_ref, w1_ref, b1_ref, w2_ref, b2_ref, o_ref):
    # x_ref : [T, P*D]    w1_ref : [P*D, P*H]   b1_ref : [1, P*H]
    # w2_ref: [P*H, P]    b2_ref : [1]  (SMEM scalar)    o_ref : [T, P]
    # fc1 + relu: block-diagonal MXU matmul, f32 accumulate.
    h = jnp.dot(x_ref[...], w1_ref[...], preferred_element_type=jnp.float32)
    h = jnp.maximum(h + b1_ref[...], 0.0)
    # fc2: second block-diagonal MXU matmul (MXU is otherwise idle here).
    z = jnp.dot(h, w2_ref[...], preferred_element_type=jnp.float32)
    z = z + b2_ref[0]
    o_ref[...] = jax.nn.sigmoid(z).astype(o_ref.dtype)


def semantic_entropy_prob_target(x, w1, b1, w2, b2, *, tile_rows=None,
                                 activation_dtype=jnp.float32):
    """Forward pass of SemanticEntropyProbTarget.

    x: [B, D] f32; w1: [D, H] (fc1 weight, pre-transposed); b1: [H];
    w2: [H, 1]; b2: [1].  Returns [B] f32 == sigmoid(relu(x@w1+b1)@w2+b2).

    activation_dtype: set to jnp.bfloat16 on v5e/v6e to halve the only large
    HBM stream (x); matmuls still accumulate in f32 (expect ~1e-2 drift).
    """
    B, D = x.shape
    H = w1.shape[-1]

    # Lane-packing factor: P rows of x per 128-lane vreg row.
    pack = 1
    if 0 < D <= 128 and 128 % D == 0:
        p = 128 // D
        if p > 1 and B % p == 0:
            pack = p

    rows = B // pack            # packed row count seen by the kernel
    din = pack * D              # packed input width  (== 128 when packed)
    hp = pack * H               # packed hidden width

    # Free, contiguous reshape (row-major bitcast); no HBM copy of x.
    x_in = x.reshape(rows, din).astype(activation_dtype)

    eye = jnp.eye(pack, dtype=jnp.float32)
    w1_p = jnp.kron(eye, w1.astype(jnp.float32)).astype(activation_dtype)  # [din, hp]
    b1_p = jnp.tile(b1.astype(jnp.float32).reshape(1, H), (1, pack))        # [1, hp]
    w2_p = jnp.kron(eye, w2.astype(jnp.float32).reshape(H, 1))              # [hp, pack]
    b2_s = b2.reshape(1).astype(jnp.float32)                                # SMEM scalar

    if tile_rows is None:
        tile_rows = _TILE_ROWS_DEFAULT
    tile_rows = _choose_tile_rows(rows, int(tile_rows))
    num_tiles = pl.cdiv(rows, tile_rows)   # non-divisible grid: no padding

    out = pl.pallas_call(
        _mlp_kernel,
        out_shape=jax.ShapeDtypeStruct((rows, pack), jnp.float32),
        grid_spec=pl.GridSpec(
            grid=(num_tiles,),
            in_specs=[
                # Activations: streamed batch tiles (double-buffered DMA).
                pl.BlockSpec((tile_rows, din), lambda i: (i, 0)),
                # Parameters: constant index maps -> VMEM-resident, one DMA.
                pl.BlockSpec((din, hp), lambda i: (0, 0)),
                pl.BlockSpec((1, hp), lambda i: (0, 0)),
                pl.BlockSpec((hp, pack), lambda i: (0, 0)),
                # fc2 bias scalar lives in SMEM (no VMEM block / DMA stream).
                pl.BlockSpec(memory_space=pltpu.MemorySpace.SMEM),
            ],
            out_specs=pl.BlockSpec((tile_rows, pack), lambda i: (i, 0)),
        ),
        compiler_params=pltpu.CompilerParams(
            # Batch tiles are independent -> megacore sharding on v7x.
            dimension_semantics=("parallel",),
        ),
    )(x_in, w1_p, b1_p, w2_p, b2_s)

    # Row-major flatten undoes the packing: [rows, pack] -> [B]; squeeze(-1)
    # for the unpacked path.  Slice is a no-op guard.
    return out.reshape(-1)[:B]


def _reference(x, w1, b1, w2, b2):
    h = jax.nn.relu(x @ w1 + b1)
    return jax.nn.sigmoid(h @ w2 + b2)[:, 0]


if __name__ == "__main__":
    key = jax.random.PRNGKey(0)
    D, H = 32, 16  # input_dim, hidden_dim

    k_x, k_w1, k_b1, k_w2, k_b2 = jax.random.split(key, 5)
    # Deterministic parameter init (mimics nn.Linear uniform init scale).
    w1 = jax.random.uniform(k_w1, (D, H), jnp.float32, -1.0, 1.0) / jnp.sqrt(D)
    b1 = jax.random.uniform(k_b1, (H,), jnp.float32, -1.0, 1.0) / jnp.sqrt(D)
    w2 = jax.random.uniform(k_w2, (H, 1), jnp.float32, -1.0, 1.0) / jnp.sqrt(H)
    b2 = jax.random.uniform(k_b2, (1,), jnp.float32, -1.0, 1.0) / jnp.sqrt(H)

    # (1) Tiny batch: packed (P=4) single-tile path.
    B = 8
    x = jax.random.normal(k_x, (B, D), dtype=jnp.float32)
    out = semantic_entropy_prob_target(x, w1, b1, w2, b2)
    jax.block_until_ready(out)
    ref = _reference(x, w1, b1, w2, b2)
    assert out.shape == (B,), out.shape
    assert jnp.allclose(out, ref, atol=1e-5, rtol=1e-5), (out, ref)

    # (2) Packed path, batch not a multiple of the tile -> cdiv grid + masked
    #     tail tile (no jnp.pad anywhere).
    B2 = 300  # 300 % 4 == 0 -> packed; 75 packed rows over 2 tiles of 40.
    x2 = jax.random.normal(jax.random.PRNGKey(1), (B2, D), dtype=jnp.float32)
    out2 = semantic_entropy_prob_target(x2, w1, b1, w2, b2, tile_rows=40)
    jax.block_until_ready(out2)
    ref2 = _reference(x2, w1, b1, w2, b2)
    assert out2.shape == (B2,), out2.shape
    assert jnp.allclose(out2, ref2, atol=1e-5, rtol=1e-5), (out2, ref2)

    # (3) Batch not divisible by the pack factor -> unpacked fallback,
    #     still pad-free via the non-divisible grid.
    B3 = 13
    x3 = jax.random.normal(jax.random.PRNGKey(2), (B3, D), dtype=jnp.float32)
    out3 = semantic_entropy_prob_target(x3, w1, b1, w2, b2)
    jax.block_until_ready(out3)
    ref3 = _reference(x3, w1, b1, w2, b2)
    assert out3.shape == (B3,), out3.shape
    assert jnp.allclose(out3, ref3, atol=1e-5, rtol=1e-5), (out3, ref3)

    print("KERNEL_OK")
</pallas_src>

<mosaic_0001>
module attributes {stable_mosaic.version = 11 : i64} {
  func.func @_mlp_kernel(%arg0: i32, %arg1: memref<2x128xf32, #tpu.memory_space<vmem>>, %arg2: memref<128x64xf32, #tpu.memory_space<vmem>>, %arg3: memref<1x64xf32, #tpu.memory_space<vmem>>, %arg4: memref<64x4xf32, #tpu.memory_space<vmem>>, %arg5: memref<1xf32, #tpu.memory_space<smem>>, %arg6: memref<2x4xf32, #tpu.memory_space<vmem>>) attributes {dimension_semantics = [#tpu.dimension_semantics<parallel>], iteration_bounds = array<i64: 1>, scalar_prefetch = 0 : i64, scratch_operands = 0 : i64, tpu.core_type = #tpu.core_type<tc>, window_params = [{transform_indices = @transform_0, window_bounds = array<i64: 2, 128>}, {pipeline_mode = #tpu.pipeline_mode<synchronous>, transform_indices = @transform_1, window_bounds = array<i64: 128, 64>}, {pipeline_mode = #tpu.pipeline_mode<synchronous>, transform_indices = @transform_2, window_bounds = array<i64: 1, 64>}, {pipeline_mode = #tpu.pipeline_mode<synchronous>, transform_indices = @transform_3, window_bounds = array<i64: 64, 4>}, {transform_indices = @transform_4, window_bounds = array<i64: 1>}, {transform_indices = @transform_5, window_bounds = array<i64: 2, 4>}]} {
    %c0 = arith.constant 0 : index
    %c0_0 = arith.constant 0 : index
    %0 = vector.load %arg1[%c0, %c0_0] : memref<2x128xf32, #tpu.memory_space<vmem>>, vector<2x128xf32>
    %c0_1 = arith.constant 0 : index
    %c0_2 = arith.constant 0 : index
    %1 = vector.load %arg2[%c0_1, %c0_2] : memref<128x64xf32, #tpu.memory_space<vmem>>, vector<128x64xf32>
    %cst = arith.constant dense<0.000000e+00> : vector<2x64xf32>
    %2 = tpu.matmul %0, %1, %cst {dimension_numbers = #tpu.dot_dimension_numbers<[1], [0], [0], [1], [0, 0, 1, 1], [], []>} : vector<2x128xf32>, vector<128x64xf32>, vector<2x64xf32> -> vector<2x64xf32>
    %c0_3 = arith.constant 0 : index
    %c0_4 = arith.constant 0 : index
    %3 = vector.load %arg3[%c0_3, %c0_4] : memref<1x64xf32, #tpu.memory_space<vmem>>, vector<1x64xf32>
    %4 = vector.broadcast %3 : vector<1x64xf32> to vector<2x64xf32>
    %5 = arith.addf %2, %4 : vector<2x64xf32>
    %cst_5 = arith.constant 0.000000e+00 : f32
    %6 = vector.broadcast %cst_5 : f32 to vector<2x64xf32>
    %7 = arith.maximumf %5, %6 : vector<2x64xf32>
    %c0_6 = arith.constant 0 : index
    %c0_7 = arith.constant 0 : index
    %8 = vector.load %arg4[%c0_6, %c0_7] : memref<64x4xf32, #tpu.memory_space<vmem>>, vector<64x4xf32>
    %cst_8 = arith.constant dense<0.000000e+00> : vector<2x4xf32>
    %9 = tpu.matmul %7, %8, %cst_8 {dimension_numbers = #tpu.dot_dimension_numbers<[1], [0], [0], [1], [0, 0, 1, 1], [], []>} : vector<2x64xf32>, vector<64x4xf32>, vector<2x4xf32> -> vector<2x4xf32>
    %c0_9 = arith.constant 0 : index
    %10 = memref.load %arg5[%c0_9] : memref<1xf32, #tpu.memory_space<smem>>
    %11 = vector.broadcast %10 : f32 to vector<2x4xf32>
    %12 = arith.addf %9, %11 : vector<2x4xf32>
    %13 = arith.negf %12 : vector<2x4xf32>
    %14 = math.exp %13 : vector<2x4xf32>
    %cst_10 = arith.constant 1.000000e+00 : f32
    %15 = vector.broadcast %cst_10 : f32 to vector<2x4xf32>
    %16 = arith.addf %15, %14 : vector<2x4xf32>
    %17 = arith.divf %15, %16 : vector<2x4xf32>
    %c0_11 = arith.constant 0 : index
    %c0_12 = arith.constant 0 : index
    %18 = vector.load %arg6[%c0_11, %c0_12] : memref<2x4xf32, #tpu.memory_space<vmem>>, vector<2x4xf32>
    tpu.vector_store %arg6[%c0_11, %c0_12], %17 {strides = array<i32>} : memref<2x4xf32, #tpu.memory_space<vmem>>, vector<2x4xf32>,
    return
  }
  func.func @transform_0(%arg0: i32) -> (i32, i32) {
    %c0_i32 = arith.constant 0 : i32
    %c0_i32_0 = arith.constant 0 : i32
    return %arg0, %c0_i32 : i32, i32
  }
  func.func @transform_1(%arg0: i32) -> (i32, i32) {
    %c0_i32 = arith.constant 0 : i32
    %c0_i32_0 = arith.constant 0 : i32
    %c0_i32_1 = arith.constant 0 : i32
    return %c0_i32, %c0_i32_0 : i32, i32
  }
  func.func @transform_2(%arg0: i32) -> (i32, i32) {
    %c0_i32 = arith.constant 0 : i32
    %c0_i32_0 = arith.constant 0 : i32
    %c0_i32_1 = arith.constant 0 : i32
    return %c0_i32, %c0_i32_0 : i32, i32
  }
  func.func @transform_3(%arg0: i32) -> (i32, i32) {
    %c0_i32 = arith.constant 0 : i32
    %c0_i32_0 = arith.constant 0 : i32
    %c0_i32_1 = arith.constant 0 : i32
    return %c0_i32, %c0_i32_0 : i32, i32
  }
  func.func @transform_4(%arg0: i32) -> i32 {
    %c0_i32 = arith.constant 0 : i32
    %c0_i32_0 = arith.constant 0 : i32
    return %c0_i32 : i32
  }
  func.func @transform_5(%arg0: i32) -> (i32, i32) {
    %c0_i32 = arith.constant 0 : i32
    %c0_i32_0 = arith.constant 0 : i32
    return %arg0, %c0_i32 : i32, i32
  }
}

</mosaic_0001>

<bundles_post_ra>
// kernel: tpu_custom_call.1
= control target key start
LH: loop header
LB: loop body
LE: loop exit
PB: predicated region body
PF: predicated region fallthrough
CT: control target
= control target key end

     0   :  { %v374_v3 = vmov 0.0|0.0   ;;  %vm375_vm0 = vmmov 0   ;;  %v376_v6 = vmov 0.0   ;;  %s501_s0 = inlined_call_operand.vmem [shape: f32[2,128], index: 0, kind: input, shape index: {}]   ;;  %s502_s1 = inlined_call_operand.vmem [shape: f32[128,64], index: 1, kind: input, shape index: {}]   ;;  %s503_s2 = inlined_call_operand.vmem [shape: f32[1,64], index: 2, kind: input, shape index: {}]   ;;  %s504_s3 = inlined_call_operand.vmem [shape: f32[64,4], index: 3, kind: input, shape index: {}]   ;;  %s505_s4 = inlined_call_operand.<no memory space> [shape: f32[1], index: 4, kind: input, shape index: {}]   ;;  %s506_s5 = inlined_call_operand.hbm [shape: f32[2,4], index: 5, kind: output, shape index: {}]  }
   0x1   :  { %v23_v0 = vld [vmem:[%s502_s1] sm:$0xff]  ;;  %v24_v1 = vld [vmem:[%s502_s1 + $0x8] sm:$0xff]  ;;  %v25_v2 = vld [vmem:[%s502_s1 + $0x10] sm:$0xff]  ;;  %306 = vmatprep.subr.bf16.mxu0 %v374_v3  ;;  %284 = vmatprep.mubr.msk.f32.mxu0 %vm375_vm0, %v376_v6 }
   0x2   :  { %v307_v4 = vpack.c.bf16 %v24_v1, %v23_v0  ;;  %v26_v5 = vld [vmem:[%s502_s1 + $0x18] sm:$0xff]  ;;  %330 = vmatprep.subr.bf16.mxu1 %v374_v3  ;;  %303 = vmatprep.mubr.msk.f32.mxu1 %vm375_vm0, %v376_v6  ;;  %v27_v8 = vld [vmem:[%s502_s1 + $0x20] sm:$0xff]  ;;  %v28_v9 = vld [vmem:[%s502_s1 + $0x28] sm:$0xff] }
   0x3   :  { %v310_v7 = vpack.c.bf16 %v26_v5, %v25_v2  ;;  %v117_v10 = vld [vmem:[%s504_s3] sm:$0xff]  ;;  %v118_v11 = vld [vmem:[%s504_s3 + $0x8] sm:$0xff]  ;;  %v119_v12 = vld [vmem:[%s504_s3 + $0x10] sm:$0xff]  ;;  %v313_v14 = vpack.c.bf16 %v28_v9, %v27_v8 }
   0x4   :  { %308 = vmatpush3.bf16.msra.mxu0 %v307_v4  ;;  %v120_v13 = vld [vmem:[%s504_s3 + $0x18] sm:$0xff]  ;;  %v331_v15 = vpack.c.bf16 %v118_v11, %v117_v10  ;;  %v29_v16 = vld [vmem:[%s502_s1 + $0x30] sm:$0xff] }
   0x5   :  { %309 = vmatprep.subr.bf16.mxu0 %v374_v3  ;;  %v30_v17 = vld [vmem:[%s502_s1 + $0x38] sm:$0xff] }
   0x8   :  { %311 = vmatpush3.bf16.msra.mxu0 %v310_v7 }
   0x9   :  { %312 = vmatprep.subr.bf16.mxu0 %v374_v3 }
   0xa   :  { %11 = vsyncpa [#allocation4], 0  ;;  %332 = vmatpush3.bf16.msra.mxu1 %v331_v15  ;;  %v334_v18 = vpack.c.bf16 %v120_v13, %v119_v12  ;;  %v121_v19 = vld [vmem:[%s504_s3 + $0x20] sm:$0xff]  ;;  %v122_v20 = vld [vmem:[%s504_s3 + $0x28] sm:$0xff]  ;;  %v316_v21 = vpack.c.bf16 %v30_v17, %v29_v16  ;;  %vm127_vm1 = vcmask 523264   ;;  %v126_v44 = vstv %s505_s4 }
   0xb   :  { %333 = vmatprep.subr.bf16.mxu1 %v374_v3  ;;  %v31_v22 = vld [vmem:[%s502_s1 + $0x40] sm:$0xff]  ;;  %v32_v23 = vld [vmem:[%s502_s1 + $0x48] sm:$0xff]  ;;  %v337_v24 = vpack.c.bf16 %v122_v20, %v121_v19  ;;  %v33_v26 = vld [vmem:[%s502_s1 + $0x50] sm:$0xff]  ;;  %vm207_vm2 = vcmask 25600  }
   0xc   :  { %314 = vmatpush3.bf16.msra.mxu0 %v313_v14  ;;  %v319_v25 = vpack.c.bf16 %v32_v23, %v31_v22  ;;  %v34_v27 = vld [vmem:[%s502_s1 + $0x58] sm:$0xff]  ;;  %v35_v29 = vld [vmem:[%s502_s1 + $0x60] sm:$0xff]  ;;  %v36_v30 = vld [vmem:[%s502_s1 + $0x68] sm:$0xff] }
   0xd   :  { %315 = vmatprep.subr.bf16.mxu0 %v374_v3  ;;  %v322_v28 = vpack.c.bf16 %v34_v27, %v33_v26  ;;  %v325_v31 = vpack.c.bf16 %v36_v30, %v35_v29  ;;  %v37_v32 = vld [vmem:[%s502_s1 + $0x70] sm:$0xff]  ;;  %v38_v33 = vld [vmem:[%s502_s1 + $0x78] sm:$0xff]  ;;  %v22_v35 = vld [vmem:[%s501_s0] sm:$0x3] }
   0xe   :  { %335 = vmatpush3.bf16.msra.mxu1 %v334_v18  ;;  %v328_v34 = vpack.c.bf16 %v38_v33, %v37_v32  ;;  %v123_v36 = vld [vmem:[%s504_s3 + $0x30] sm:$0xff]  ;;  %v124_v37 = vld [vmem:[%s504_s3 + $0x38] sm:$0xff]  ;;  %v223_v39 = vld [vmem:[%s503_s2] ss:$0 sm:$0xff]  ;;  %s377_s3 = smov [#allocation3]  }
   0xf   :  { %336 = vmatprep.subr.bf16.mxu1 %v374_v3  ;;  %v340_v38 = vpack.c.bf16 %v124_v37, %v123_v36  ;;  %s215_s2 = sshll.u32 %s377_s3, 4  ;;  %s216_s2 = int_to_ptr.vmem [resolvable:$true] %s215_s2 }
  0x10   :  { %317 = vmatpush3.bf16.msra.mxu0 %v316_v21  ;;  %s350_s20 = scalar_lea.vmem %s216_s2, 32  ;;  %p355_p1 = scmp.lt.s32.totalorder %s216_s2, %s216_s2 }
  0x11   :  { %318 = vmatprep.subr.bf16.mxu0 %v374_v3  ;;  %p351_p0 = scmp.ne.s32.totalorder %s216_s2, %s350_s20  ;;  %p356_p2 = scmp.lt.s32.totalorder %s350_s20, %s350_s20 }
  0x12   :  { %338 = vmatpush3.bf16.msra.mxu1 %v337_v24 }
  0x13   :  { %339 = vmatprep.subr.bf16.mxu1 %v374_v3  ;;  %p357_p3 = por %p356_p2, %p355_p1 }
  0x14   :  { %320 = vmatpush3.bf16.msra.mxu0 %v319_v25 }
  0x15   :  { %321 = vmatprep.subr.bf16.mxu0 %v374_v3  ;;  %p358_p4 = pnand %p357_p3, %p351_p0 }
  0x16   :  { %341 = vmatpush3.bf16.msra.mxu1 %v340_v38 }
  0x18   :  { %323 = vmatpush3.bf16.msra.mxu0 %v322_v28 }
  0x19   :  { %324 = vmatprep.subr.bf16.mxu0 %v374_v3 }
  0x1c   :  { %326 = vmatpush3.bf16.msra.mxu0 %v325_v31 }
  0x1d   :  { %327 = vmatprep.subr.bf16.mxu0 %v374_v3 }
  0x20   :  { %329 = vmatpush3.bf16.msra.mxu0 %v328_v34 }
  0x23   :  { %285 = vmatmul.mubr.f32.vlgmr.msra.gmra.mrb[0].mxu0 %v22_v35 }
  0xf6   :  { %v112_v40 = vpop.f32.mrb[0].mxu0 }
  0xf7   :  { %v113_v41 = vadd.f32 %v223_v39, %v112_v40  ;;  %v286_v42 = vpop.f32.mrb[1].mxu0 }
  0xf9   :  { %v116_v43 = vmax.f32 %v113_v41, 0.0 }
  0xfb   :  { %304 = vmatmul.mubr.msk.f32.vlgmr.msra.gmra.mrb[0].mxu1 %vm127_vm1, %v116_v43 }
 0x1ce   :  { %v197_v45 = vpop.f32.mrb[0].mxu1 }
 0x1cf   :  { %v198_v46 = vadd.f32 %v197_v45, %v126_v44  ;;  %v305_v47 = vpop.f32.mrb[1].mxu1 }
 0x1d1   :  { %v225_v48 = vmul.f32 -1.442695, %v198_v46 }
 0x1d3   :  { %346 = vpow2.f32 %v225_v48 }
 0x1dd   :  { %v347_v49 = vpop.eup %346 }
 0x1de   :  { %v204_v50 = vadd.f32 1.0, %v347_v49 }
 0x1e0   :  { %348 = vrcp.f32 %v204_v50 }
 0x1ea   :  { %v349_v51 = vpop.eup %348 }
 0x1eb   :  { %208 = vst.msk [vmem:[#allocation3] sm:$0x3] %vm207_vm2, %v349_v51 }
 0x1ec   :  { %361 = shalt.err (!%p358_p4)
}
 0x1ed   :  { %s362_s22 = scalar_lea.hbm %s506_s5, 32 }
 0x1ee   :  { %p363_p5 = scmp.ne.s32.totalorder %s506_s5, %s362_s22  ;;  %p366_p6 = scmp.lt.u32.totalorder %s362_s22, %s506_s5 }
 0x1f0   :  { %p368_p7 = pnand %p366_p6, %p363_p5 }
 0x1f2   :  { %371 = shalt.err (!%p368_p7)
}
 0x1f3   :  { %218 = dma.vmem_to_hbm [thread:$0]  %s216_s2, 32, %s506_s5, [#allocation4]  }
 0x1f4   :  { %372 = dma.done.wait [#allocation4], 32  }
 0x1f5   :  { %373 = vsyncadd [#allocation4], 4294967264 }
 0x1f6   :  { %222 = vsyncpa [#allocation4], 1 }

</bundles_post_ra>
